<compile_context>
chip_gen: v5e
topology: v5e:2x2
jax: 0.10.0
libtpu: 0.0.40
codegen_flags: <defaults>
</compile_context>

<pallas_src>
import functools

import jax
import jax.numpy as jnp
from jax import lax
from jax.experimental import pallas as pl
from jax.experimental.pallas import tpu as pltpu


def _partial_fmaps_kernel(r_ref, cfp_ref, cpf_ref, out_ref, *, k, w_bij, need_orth):
    # r_ref: (1,) int32 in SMEM (scalar prefetch). cfp/cpf refs: (K, K) VMEM
    # (batch dim squeezed by the BlockSpec). out_ref: (2,) f32 in SMEM.
    r = r_ref[0]
    eye_norm = (r + 1).astype(jnp.float32)          # sum(I_r^2) = r + 1
    w = jnp.float32(w_bij)

    # Masked identity I_r as an f32 mask, shared by both terms.
    row = lax.broadcasted_iota(jnp.int32, (k, k), 0)
    col = lax.broadcasted_iota(jnp.int32, (k, k), 1)
    diag_f = ((col == row) & (row <= r)).astype(jnp.float32)

    cfp = cfp_ref[...]                               # (K, K), native dtype

    # Bijectivity: ||C_fp @ C_pf - I_r||_F^2 = sum(M*(M - 2*I_r)) + (r+1)
    m_bij = jnp.dot(cfp, cpf_ref[...], preferred_element_type=jnp.float32)
    out_ref[0] = w * (jnp.sum(m_bij * (m_bij - 2.0 * diag_f)) + eye_norm)

    if need_orth:
        # Orthogonality: C_fp @ C_fp^T with the transpose folded into the
        # MXU contraction (no explicit .T / XLU transpose).
        m_orth = lax.dot_general(cfp, cfp, (((1,), (1,)), ((), ())),
                                 preferred_element_type=jnp.float32)
        out_ref[1] = w * (jnp.sum(m_orth * (m_orth - 2.0 * diag_f)) + eye_norm)
    else:
        out_ref[1] = jnp.float32(0.0)


def partial_fmaps_loss(C_fp, C_pf, evals_full, evals_partial,
                       w_bij=1.0, w_orth=1.0):
    """Pallas implementation of PartialFmapsLoss.forward (batch size must be 1)."""
    assert w_bij >= 0 and w_orth >= 0, 'Loss weight should be non-negative.'
    assert C_fp.shape[0] == 1, 'Currently, only support batch size = 1'
    k = C_fp.shape[1]

    # NOTE: the reference PyTorch scales the orth term by w_bij (reproduced),
    # so the orth term is statically zero whenever w_bij == 0.
    need_bij = w_bij > 0
    need_orth = (w_orth > 0) and (w_bij > 0)

    zero = jnp.float32(0.0)
    if not need_bij and not need_orth:
        return {'l_bij': zero, 'l_orth': zero}

    # r = min((evals_partial < evals_full.max()).sum(), K - 1), computed with a
    # tiny jnp reduce in the wrapper and handed to the kernel via scalar
    # prefetch (drops the eigenvalue VMEM input + its DMA).
    ef = jnp.asarray(evals_full)[0]
    ep = jnp.asarray(evals_partial)[0]
    count = jnp.sum((ep < jnp.max(ef)).astype(jnp.int32))
    r = jnp.minimum(count, k - 1).astype(jnp.int32).reshape((1,))

    kernel = functools.partial(_partial_fmaps_kernel, k=k, w_bij=float(w_bij),
                               need_orth=need_orth)

    grid_spec = pltpu.PrefetchScalarGridSpec(
        num_scalar_prefetch=1,
        grid=(1,),
        in_specs=[
            # Native (1, K, K) inputs; leading batch dim squeezed out.
            pl.BlockSpec((None, k, k), lambda i, r_ref: (0, 0, 0)),
            pl.BlockSpec((None, k, k), lambda i, r_ref: (0, 0, 0)),
        ],
        out_specs=pl.BlockSpec(memory_space=pltpu.MemorySpace.SMEM),
    )

    out = pl.pallas_call(
        kernel,
        out_shape=jax.ShapeDtypeStruct((2,), jnp.float32),
        grid_spec=grid_spec,
        compiler_params=pltpu.CompilerParams(
            dimension_semantics=("arbitrary",)),
    )(r, jnp.asarray(C_fp), jnp.asarray(C_pf))

    l_bij = out[0] if need_bij else zero
    l_orth = out[1] if need_orth else zero
    return {'l_bij': l_bij, 'l_orth': l_orth}


def _reference(C_fp, C_pf, evals_full, evals_partial, w_bij=1.0, w_orth=1.0):
    """Pure-JAX reference mirroring the PyTorch semantics, for verification."""
    cfp, cpf = C_fp[0].astype(jnp.float32), C_pf[0].astype(jnp.float32)
    ef, ep = evals_full[0], evals_partial[0]
    k = cfp.shape[0]
    r = jnp.minimum(jnp.sum((ep < ef.max()).astype(jnp.int32)), k - 1)
    idx = jnp.arange(k)
    eye = jnp.where((idx[:, None] == idx[None, :]) & (idx[:, None] <= r), 1.0, 0.0)

    def sq_frob(a, b):
        return jnp.mean(jnp.sum(jnp.abs(a - b) ** 2, axis=(-2, -1)))

    zero = jnp.float32(0.0)
    l_bij = w_bij * sq_frob(cfp @ cpf, eye) if w_bij > 0 else zero
    # NOTE: reference PyTorch multiplies the orth term by w_bij (reproduced).
    l_orth = w_bij * sq_frob(cfp @ cfp.T, eye) if w_orth > 0 else zero
    return {'l_bij': l_bij, 'l_orth': l_orth}


if __name__ == "__main__":
    key = jax.random.PRNGKey(0)
    k1, k2, k3, k4 = jax.random.split(key, 4)

    K = 32
    C_fp = jax.random.normal(k1, (1, K, K), jnp.float32)
    C_pf = jax.random.normal(k2, (1, K, K), jnp.float32)
    evals_full = jnp.sort(jnp.abs(jax.random.normal(k3, (1, K), jnp.float32)), axis=-1)
    evals_partial = jnp.sort(jnp.abs(jax.random.normal(k4, (1, K), jnp.float32)), axis=-1)

    ok = True
    for wb, wo in [(1.0, 1.0), (1.0, 0.0), (0.0, 1.0), (0.5, 2.0)]:
        out = partial_fmaps_loss(C_fp, C_pf, evals_full, evals_partial,
                                 w_bij=wb, w_orth=wo)
        out = jax.tree_util.tree_map(jax.block_until_ready, out)
        ref = _reference(C_fp, C_pf, evals_full, evals_partial,
                         w_bij=wb, w_orth=wo)
        ok &= bool(jnp.allclose(out['l_bij'], ref['l_bij'], rtol=1e-4, atol=1e-4))
        ok &= bool(jnp.allclose(out['l_orth'], ref['l_orth'], rtol=1e-4, atol=1e-4))

    if not ok:
        raise AssertionError("Pallas result does not match reference")

    print("KERNEL_OK")
</pallas_src>

<mosaic_0001>
module attributes {stable_mosaic.version = 11 : i64} {
  func.func @_partial_fmaps_kernel(%arg0: i32, %arg1: memref<1xi32, #tpu.memory_space<smem>>, %arg2: memref<1x32x32xf32, #tpu.memory_space<vmem>>, %arg3: memref<1x32x32xf32, #tpu.memory_space<vmem>>, %arg4: memref<2xf32, #tpu.memory_space<smem>>) attributes {dimension_semantics = [#tpu.dimension_semantics<arbitrary>], iteration_bounds = array<i64: 1>, scalar_prefetch = 1 : i64, scratch_operands = 0 : i64, tpu.core_type = #tpu.core_type<tc>, window_params = [{pipeline_mode = #tpu.pipeline_mode<synchronous>, transform_indices = @transform_0, window_bounds = array<i64: 1, 32, 32>}, {pipeline_mode = #tpu.pipeline_mode<synchronous>, transform_indices = @transform_1, window_bounds = array<i64: 1, 32, 32>}, {transform_indices = @transform_2, window_bounds = array<i64: 2>}]} {
    %c0 = arith.constant 0 : index
    %0 = memref.load %arg1[%c0] : memref<1xi32, #tpu.memory_space<smem>>
    %c1_i32 = arith.constant 1 : i32
    %1 = arith.addi %0, %c1_i32 : i32
    %2 = arith.sitofp %1 : i32 to f32
    %3 = tpu.iota {dimensions = array<i32: 0>} : vector<32x32xi32>
    %4 = tpu.iota {dimensions = array<i32: 1>} : vector<32x32xi32>
    %5 = arith.cmpi eq, %4, %3 : vector<32x32xi32>
    %6 = vector.broadcast %0 : i32 to vector<32x32xi32>
    %7 = arith.cmpi sle, %3, %6 : vector<32x32xi32>
    %8 = arith.andi %5, %7 : vector<32x32xi1>
    %9 = arith.extui %8 : vector<32x32xi1> to vector<32x32xi32>
    %10 = arith.sitofp %9 : vector<32x32xi32> to vector<32x32xf32>
    %c0_0 = arith.constant 0 : index
    %c0_1 = arith.constant 0 : index
    %c0_2 = arith.constant 0 : index
    %11 = vector.load %arg2[%c0_0, %c0_1, %c0_2] : memref<1x32x32xf32, #tpu.memory_space<vmem>>, vector<1x32x32xf32>
    %12 = vector.shape_cast %11 : vector<1x32x32xf32> to vector<32x32xf32>
    %c0_3 = arith.constant 0 : index
    %c0_4 = arith.constant 0 : index
    %c0_5 = arith.constant 0 : index
    %13 = vector.load %arg3[%c0_3, %c0_4, %c0_5] : memref<1x32x32xf32, #tpu.memory_space<vmem>>, vector<1x32x32xf32>
    %14 = vector.shape_cast %13 : vector<1x32x32xf32> to vector<32x32xf32>
    %cst = arith.constant dense<0.000000e+00> : vector<32x32xf32>
    %15 = tpu.matmul %12, %14, %cst {dimension_numbers = #tpu.dot_dimension_numbers<[1], [0], [0], [1], [0, 0, 1, 1], [], []>} : vector<32x32xf32>, vector<32x32xf32>, vector<32x32xf32> -> vector<32x32xf32>
    %cst_6 = arith.constant 2.000000e+00 : f32
    %16 = vector.broadcast %cst_6 : f32 to vector<32x32xf32>
    %17 = arith.mulf %16, %10 : vector<32x32xf32>
    %18 = arith.subf %15, %17 : vector<32x32xf32>
    %19 = arith.mulf %15, %18 : vector<32x32xf32>
    %20 = vector.shape_cast %19 : vector<32x32xf32> to vector<1x32x32xf32>
    %cst_7 = arith.constant dense<0.000000e+00> : vector<1xf32>
    %21 = vector.multi_reduction <add>, %20, %cst_7 [1, 2] : vector<1x32x32xf32> to vector<1xf32>
    %22 = vector.shape_cast %21 : vector<1xf32> to vector<1x1x1xf32>
    %23 = vector.extract %22[0, 0, 0] : f32 from vector<1x1x1xf32>
    %24 = arith.addf %23, %2 : f32
    %cst_8 = arith.constant 1.000000e+00 : f32
    %25 = arith.mulf %cst_8, %24 : f32
    %c0_9 = arith.constant 0 : index
    %26 = memref.load %arg4[%c0_9] : memref<2xf32, #tpu.memory_space<smem>>
    memref.store %25, %arg4[%c0_9] : memref<2xf32, #tpu.memory_space<smem>>
    %cst_10 = arith.constant dense<0.000000e+00> : vector<32x32xf32>
    %27 = tpu.matmul %12, %12, %cst_10 {dimension_numbers = #tpu.dot_dimension_numbers<[1], [1], [0], [0], [0, 0, 1, 0], [], []>} : vector<32x32xf32>, vector<32x32xf32>, vector<32x32xf32> -> vector<32x32xf32>
    %cst_11 = arith.constant 2.000000e+00 : f32
    %28 = vector.broadcast %cst_11 : f32 to vector<32x32xf32>
    %29 = arith.mulf %28, %10 : vector<32x32xf32>
    %30 = arith.subf %27, %29 : vector<32x32xf32>
    %31 = arith.mulf %27, %30 : vector<32x32xf32>
    %32 = vector.shape_cast %31 : vector<32x32xf32> to vector<1x32x32xf32>
    %cst_12 = arith.constant dense<0.000000e+00> : vector<1xf32>
    %33 = vector.multi_reduction <add>, %32, %cst_12 [1, 2] : vector<1x32x32xf32> to vector<1xf32>
    %34 = vector.shape_cast %33 : vector<1xf32> to vector<1x1x1xf32>
    %35 = vector.extract %34[0, 0, 0] : f32 from vector<1x1x1xf32>
    %36 = arith.addf %35, %2 : f32
    %cst_13 = arith.constant 1.000000e+00 : f32
    %37 = arith.mulf %cst_13, %36 : f32
    %c1 = arith.constant 1 : index
    %38 = memref.load %arg4[%c1] : memref<2xf32, #tpu.memory_space<smem>>
    memref.store %37, %arg4[%c1] : memref<2xf32, #tpu.memory_space<smem>>
    return
  }
  func.func @transform_0(%arg0: i32, %arg1: memref<1xi32, #tpu.memory_space<smem>>) -> (i32, i32, i32) {
    %c0_i32 = arith.constant 0 : i32
    %c0_i32_0 = arith.constant 0 : i32
    %c0_i32_1 = arith.constant 0 : i32
    %c0_i32_2 = arith.constant 0 : i32
    return %c0_i32, %c0_i32_0, %c0_i32_1 : i32, i32, i32
  }
  func.func @transform_1(%arg0: i32, %arg1: memref<1xi32, #tpu.memory_space<smem>>) -> (i32, i32, i32) {
    %c0_i32 = arith.constant 0 : i32
    %c0_i32_0 = arith.constant 0 : i32
    %c0_i32_1 = arith.constant 0 : i32
    %c0_i32_2 = arith.constant 0 : i32
    return %c0_i32, %c0_i32_0, %c0_i32_1 : i32, i32, i32
  }
  func.func @transform_2(%arg0: i32, %arg1: memref<1xi32, #tpu.memory_space<smem>>) -> i32 {
    %c0_i32 = arith.constant 0 : i32
    %c0_i32_0 = arith.constant 0 : i32
    return %c0_i32 : i32
  }
}

</mosaic_0001>

<bundles_post_ra>
// kernel: tpu_custom_call.1
= control target key start
LH: loop header
LB: loop body
LE: loop exit
PB: predicated region body
PF: predicated region fallthrough
CT: control target
= control target key end

     0   :  { %9 = vsyncpa [#allocation5], 0  ;;  %s396_s0 = inlined_call_operand.<no memory space> [shape: s32[1], index: 0, kind: input, shape index: {}]   ;;  %s397_s1 = inlined_call_operand.hbm [shape: f32[1,32,32], index: 1, kind: input, shape index: {}]   ;;  %s398_s2 = inlined_call_operand.hbm [shape: f32[1,32,32], index: 2, kind: input, shape index: {}]   ;;  %s399_s3 = inlined_call_operand.hbm [shape: f32[2], index: 3, kind: output, shape index: {}]  }
   0x1   :  { %10 = vsyncpa [#allocation8], 0 }
   0x2   :  { %11 = vsyncpa [#allocation6], 0  ;;  %s16_s14 = sshll.u32 %s397_s1, 4  ;;  %s331_s15 = smov [#allocation4]   ;;  %s17_s14 = int_to_ptr.hbm [resolvable:$true] %s16_s14 }
   0x3   :  { %s18_s16 = sshll.u32 %s331_s15, 4  ;;  %s29_s19 = sshll.u32 %s398_s2, 4  ;;  %s19_s16 = int_to_ptr.vmem [resolvable:$true] %s18_s16  ;;  %s30_s19 = int_to_ptr.hbm [resolvable:$true] %s29_s19 }
   0x4   :  { %s332_s20 = smov 128   ;;  %s333_s21 = smov 8  }
   0x5   :  { %24 = dma.hbm_to_vmem [thread:$0]  %s17_s14, 512, %s19_s16, [#allocation5], %s332_s20, %s332_s20, %s333_s21  }
   0x6   :  { %s334_s22 = smov [#allocation7]  }
   0x7   :  { %s31_s23 = sshll.u32 %s334_s22, 4  ;;  %s32_s23 = int_to_ptr.vmem [resolvable:$true] %s31_s23 }
   0x8   :  { %37 = dma.hbm_to_vmem [thread:$0]  %s30_s19, 512, %s32_s23, [#allocation8], %s332_s20, %s332_s20, %s333_s21  }
   0x9   :  { %325 = dma.done.wait [#allocation5], 512  }
   0xa   :  { %326 = vsyncadd [#allocation5], 4294966784 }
   0xb   :  { %327 = dma.done.wait [#allocation8], 512  }
   0xc   :  { %328 = vsyncadd [#allocation8], 4294966784  ;;  %vm85_vm0 = vcmask 261120   ;;  %v84_v0 = vld [vmem:[#allocation7 + $0x18] sm:$0xff]  ;;  %v83_v2 = vld [vmem:[#allocation7 + $0x10] sm:$0xff]  ;;  %v49_v8 = vlaneseq  ;;  %v60_v11 = vstv %s396_s0  ;;  %v335_v14 = vmov 0.0  }
   0xd   :  { %v80_v1 = vld [vmem:[#allocation4 + $0x18] sm:$0xff]  ;;  %247 = vmatpush.msra.mxu3 %v84_v0  ;;  %v82_v3 = vld [vmem:[#allocation7 + $0x8] sm:$0xff]  ;;  %v79_v4 = vld [vmem:[#allocation4 + $0x10] sm:$0xff]  ;;  %110 = vmatpush.msra.mxu0 %v84_v0  ;;  %s47_s26 = sadd.s32 1, %s396_s0  ;;  %s219_s5 = sshll.u32 %s399_s3, 4  ;;  %s220_s5 = int_to_ptr.hbm [resolvable:$true] %s219_s5 }
   0xe   :  { %239 = vmatpush.xpose.msk.msra.mxu1 %vm85_vm0, %v80_v1  ;;  %251 = vmatpush.xpose.msk.msra.mxu2 %vm85_vm0, %v80_v1  ;;  %v81_v5 = vld [vmem:[#allocation7] sm:$0xff]  ;;  %v78_v6 = vld [vmem:[#allocation4 + $0x8] sm:$0xff]  ;;  %v50_v9 = vshrl.u32 %v49_v8, 7  ;;  %v55_v10 = vand.u32 127, %v49_v8  ;;  %s48_s27 = scvt.s32.f32 %s47_s26  ;;  %s336_s8 = smov [#allocation9]  }
   0xf   :  { %248 = vmatpush.msra.mxu3 %v83_v2  ;;  %111 = vmatpush.msra.mxu0 %v83_v2  ;;  %v77_v7 = vld [vmem:[#allocation4] sm:$0xff] }
  0x10   :  { %v51_v12 = vadd.s32 8, %v50_v9  ;;  %v52_v13 = vadd.s32 16, %v50_v9  ;;  %vm56_vm1 = vcmp.eq.s32.totalorder %v55_v10, %v50_v9  ;;  %vm61_vm2 = vcmp.le.s32.totalorder %v50_v9, %v60_v11 }
  0x11   :  { %249 = vmatpush.msra.mxu3 %v82_v3  ;;  %112 = vmatpush.msra.mxu0 %v82_v3  ;;  %vm65_vm5 = vmand %vm56_vm1, %vm61_vm2  ;;  %v53_v18 = vadd.s32 24, %v50_v9 }
  0x12   :  { %240 = vmatpush.xpose.msk.msra.mxu1 %vm85_vm0, %v79_v4  ;;  %252 = vmatpush.xpose.msk.msra.mxu2 %vm85_vm0, %v79_v4  ;;  %vm57_vm3 = vcmp.eq.s32.totalorder %v55_v10, %v51_v12  ;;  %vm62_vm4 = vcmp.le.s32.totalorder %v51_v12, %v60_v11  ;;  %vm58_vm6 = vcmp.eq.s32.totalorder %v55_v10, %v52_v13  ;;  %v231_v15 = vsel %vm65_vm5, 1.0, %v335_v14 }
  0x13   :  { %250 = vmatpush.msra.mxu3 %v81_v5  ;;  %113 = vmatpush.msra.mxu0 %v81_v5  ;;  %vm63_vm7 = vcmp.le.s32.totalorder %v52_v13, %v60_v11  ;;  %vm66_vm8 = vmand %vm57_vm3, %vm62_vm4  ;;  %v127_v21 = vmul.f32 2.0, %v231_v15  ;;  %vm59_vm10 = vcmp.eq.s32.totalorder %v55_v10, %v53_v18  ;;  %vm64_vm11 = vcmp.le.s32.totalorder %v53_v18, %v60_v11 }
  0x14   :  { %236 = vmatmul.msk.f32.vlgmr.msra.gmra.mxu3 %vm85_vm0, %v78_v6  ;;  %235 = vmatmul.msk.f32.vlgmr.msra.gmra.mxu0 %vm85_vm0, %v77_v7  ;;  %vm67_vm9 = vmand %vm58_vm6, %vm63_vm7  ;;  %v232_v16 = vsel %vm66_vm8, 1.0, %v335_v14 }
  0x15   :  { %v233_v20 = vsel %vm67_vm9, 1.0, %v335_v14  ;;  %v128_v22 = vmul.f32 2.0, %v232_v16  ;;  %vm68_vm12 = vmand %vm59_vm10, %vm64_vm11 }
  0x16   :  { %241 = vmatpush.xpose.msk.msra.mxu1 %vm85_vm0, %v78_v6  ;;  %253 = vmatpush.xpose.msk.msra.mxu2 %vm85_vm0, %v78_v6  ;;  %v129_v24 = vmul.f32 2.0, %v233_v20  ;;  %v234_v31 = vsel %vm68_vm12, 1.0, %v335_v14 }
  0x17   :  { %v130_v37 = vmul.f32 2.0, %v234_v31 }
  0x1a   :  { %242 = vmatpush.xpose.msk.msra.mxu1 %vm85_vm0, %v77_v7  ;;  %254 = vmatpush.xpose.msk.msra.mxu2 %vm85_vm0, %v77_v7 }
  0x1c   :  { %237 = vmatmul.msk.f32.gmra.mxu3 %vm85_vm0, %v79_v4 }
  0x1d   :  { %243 = vmatmul.msk.f32.vlgmr.msra.gmra.mxu1 %vm85_vm0, %v77_v7  ;;  %245 = vmatmul.msk.f32.vlgmr.msra.gmra.mxu2 %vm85_vm0, %v79_v4 }
  0x24   :  { %238 = vmatmul.msk.f32.gmra.mxu3 %vm85_vm0, %v80_v1 }
  0x25   :  { %244 = vmatmul.msk.f32.gmra.mxu1 %vm85_vm0, %v78_v6  ;;  %246 = vmatmul.msk.f32.gmra.mxu2 %vm85_vm0, %v80_v1 }
  0x91   :  { %v115_v23 = vpop.f32.mrf.mxu0 }
  0x92   :  { %v131_v25 = vsub.f32 %v115_v23, %v127_v21 }
  0x94   :  { %v135_v32 = vmul.f32 %v131_v25, %v115_v23 }
  0x96   :  { %v139_v38 = vsel %vm85_vm0, %v135_v32, 0.0 }
  0x97   :  { %v118_v17 = vpop.f32.mrf.mxu3 }
  0x98   :  { %v132_v26 = vsub.f32 %v118_v17, %v128_v22 }
  0x9a   :  { %v175_v19 = vpop.f32.mrf.mxu1  ;;  %v136_v33 = vmul.f32 %v132_v26, %v118_v17 }
  0x9b   :  { %v187_v34 = vsub.f32 %v175_v19, %v127_v21 }
  0x9c   :  { %v140_v39 = vsel %vm85_vm0, %v136_v33, 0.0 }
  0x9d   :  { %v191_v40 = vmul.f32 %v187_v34, %v175_v19  ;;  %v141_v47 = vadd.f32 %v140_v39, %v139_v38 }
  0x9f   :  { %v121_v27 = vpop.f32.mrf.mxu3  ;;  %v195_v51 = vsel %vm85_vm0, %v191_v40, 0.0 }
  0xa0   :  { %v133_v28 = vsub.f32 %v121_v27, %v129_v24  ;;  %v181_v29 = vpop.f32.mrf.mxu2 }
  0xa1   :  { %v189_v42 = vsub.f32 %v181_v29, %v129_v24 }
  0xa2   :  { %v178_v30 = vpop.f32.mrf.mxu1  ;;  %v137_v35 = vmul.f32 %v133_v28, %v121_v27 }
  0xa3   :  { %v188_v36 = vsub.f32 %v178_v30, %v128_v22  ;;  %v193_v52 = vmul.f32 %v189_v42, %v181_v29 }
  0xa4   :  { %v142_v46 = vsel %vm85_vm0, %v137_v35, 0.0 }
  0xa5   :  { %v192_v43 = vmul.f32 %v188_v36, %v178_v30  ;;  %v143_v50 = vadd.f32 %v142_v46, %v141_v47  ;;  %v198_v58 = vsel %vm85_vm0, %v193_v52, 0.0 }
  0xa7   :  { %v124_v41 = vpop.f32.mrf.mxu3  ;;  %v196_v53 = vsel %vm85_vm0, %v192_v43, 0.0 }
  0xa8   :  { %v134_v44 = vsub.f32 %v124_v41, %v130_v37  ;;  %v184_v45 = vpop.f32.mrf.mxu2  ;;  %v197_v57 = vadd.f32 %v196_v53, %v195_v51 }
  0xa9   :  { %v190_v49 = vsub.f32 %v184_v45, %v130_v37 }
  0xaa   :  { %v138_v48 = vmul.f32 %v134_v44, %v124_v41  ;;  %v199_v60 = vadd.f32 %v198_v58, %v197_v57 }
  0xab   :  { %v194_v56 = vmul.f32 %v190_v49, %v184_v45 }
  0xac   :  { %v144_v54 = vsel %vm85_vm0, %v138_v48, 0.0 }
  0xad   :  { %v145_v55 = vadd.f32 %v144_v54, %v143_v50  ;;  %v200_v59 = vsel %vm85_vm0, %v194_v56, 0.0 }
  0xae   :  { %v201_v61 = vadd.f32 %v200_v59, %v199_v60 }
  0xaf   :  { %146 = vadd.xlane.f32.xlu0 %v145_v55 }
  0xb7   :  { %202 = vadd.xlane.f32.xlu0 %v201_v61 }
 0x122   :  { %v147_v62 = vpop.xlane.xlu0 %146 }
 0x123   :  { %v148_v63 = vrot.slane %v147_v62, 4 }
 0x125   :  { %v149_v0 = vadd.f32 %v148_v63, %v147_v62 }
 0x127   :  { %v150_v1 = vrot.slane %v149_v0, 2 }
 0x129   :  { %v151_v2 = vadd.f32 %v150_v1, %v149_v0 }
 0x12a   :  { %v203_v3 = vpop.xlane.xlu0 %202 }
 0x12b   :  { %v204_v4 = vrot.slane %v203_v3, 4  ;;  %v152_v5 = vrot.slane %v151_v2, 1 }
 0x12d   :  { %v205_v6 = vadd.f32 %v204_v4, %v203_v3  ;;  %v153_v7 = vadd.f32 %v152_v5, %v151_v2 }
 0x12f   :  { %v206_v8 = vrot.slane %v205_v6, 2  ;;  %255 = vpush %v153_v7 }
 0x131   :  { %v207_v9 = vadd.f32 %v206_v8, %v205_v6 }
 0x133   :  { %v208_v10 = vrot.slane %v207_v9, 1 }
 0x135   :  { %v209_v11 = vadd.f32 %v208_v10, %v207_v9 }
 0x137   :  { %257 = vpush %v209_v11 }
 0x160   :  { %s256_s28 = spop %255 }
 0x161   :  { %s155_s29 = sadd.f32 %s256_s28, %s48_s27 }
 0x163   :  { %157 = sst [smem:[#allocation9]] %s155_s29 }
 0x168   :  { %s258_s6 = spop %257 }
 0x169   :  { %s211_s7 = sadd.f32 %s258_s6, %s48_s27 }
 0x16b   :  { %213 = sst [smem:[#allocation9 + $0x1]] %s211_s7 }
 0x16c   :  { %222 = dma.smem_to_hbm %s336_s8, 16, %s220_s5, [#allocation6]  }
 0x16d   :  { %329 = dma.done.wait [#allocation6], 16  }
 0x16e   :  { %330 = vsyncadd [#allocation6], 4294967280 }
 0x16f   :  { %227 = sfence }
 0x170   :  { %228 = vsyncpa [#allocation5], 1 }
 0x171   :  { %229 = vsyncpa [#allocation8], 1 }
 0x172   :  { %230 = vsyncpa [#allocation6], 1 }

</bundles_post_ra>
